<compile_context>
chip_gen: v7x
topology: tpu7x:2x2x1
jax: 0.10.0
libtpu: 0.0.40
codegen_flags: <defaults>
</compile_context>

<pallas_src>
import itertools
from functools import partial

import numpy as np
import jax
import jax.numpy as jnp
from jax.experimental import pallas as pl
from jax.experimental.pallas import tpu as pltpu


def _round_up(x, m):
    return ((x + m - 1) // m) * m


def _hcc_kernel(y_ref, scores_ref, cm_ref):
    """Accumulate cm[target, prediction] for one (TB, C) batch tile."""
    k = pl.program_id(1)

    # cm block is resident across the (arbitrary) batch-tile axis: zero it once.
    @pl.when(k == 0)
    def _init():
        cm_ref[...] = jnp.zeros_like(cm_ref)

    scores = scores_ref[...]              # (TB, C) f32  (rows past B are garbage)
    y_row = y_ref[...]                    # (1, TB) i32  (rows past B are -1)
    TB, C = scores.shape

    # predictions = argmax(scores, dim=1), first index of the max.
    col_ids = jax.lax.broadcasted_iota(jnp.int32, (TB, C), 1)
    row_max = jnp.max(scores, axis=1, keepdims=True)
    pred = jnp.min(jnp.where(scores == row_max, col_ids, C), axis=1, keepdims=True)

    # one-hots in bf16 (0/1 exact), MXU-native, f32 accumulate.
    pred_onehot = (col_ids == pred).astype(jnp.bfloat16)       # (TB, C)

    # Label one-hot built already transposed (C, TB): classes on sublanes,
    # batch on lanes -> standard contraction, no per-step transpose.  Padded /
    # out-of-range rows have y == -1 -> all-zero column -> zero contribution.
    class_ids = jax.lax.broadcasted_iota(jnp.int32, (C, TB), 0)
    y_onehot_t = (class_ids == y_row).astype(jnp.bfloat16)     # (C, TB)

    cm_ref[...] += jax.lax.dot_general(
        y_onehot_t, pred_onehot,
        dimension_numbers=(((1,), (0,)), ((), ())),
        preferred_element_type=jnp.float32,
    )


@partial(jax.jit, static_argnames=("tb", "num_partitions"))
def hcc_pallas_core(y, scores, tb=1024, num_partitions=2):
    """Returns (masked_cm (C,C), entry (C,), idx (C,)) as torch.max(cm*mask, dim=0)."""
    B, C = scores.shape
    scores = jnp.asarray(scores, jnp.float32)
    # TODO(synk): optional bf16 scores input path would halve the dominant HBM
    # stream; kept f32 to preserve the reference argmax/tie semantics exactly.

    # ---- batch tile: largest of {2048,1024,512,256,128} that respects the
    # caller cap, the batch size, and a conservative 32 MiB VMEM budget (safe on
    # v5e/v6e/v7x; explicit vmem_limit_bytes below keeps double-buffering alive).
    vmem_budget = 32 * 1024 * 1024

    def _step_bytes(t):
        # 2x double-buffered scores + y blocks, ~6x f32 temporaries, cm blocks.
        return 2 * t * C * 4 + 2 * t * 4 + 6 * t * C * 4 + 4 * C * C * 4

    tb_cap = min(_round_up(tb, 128), _round_up(B, 128))
    TB = 128
    for cand in (2048, 1024, 512, 256, 128):
        if cand <= tb_cap and _step_bytes(cand) <= vmem_budget:
            TB = cand
            break

    n_tiles = -(-B // TB)                       # real batch tiles
    NC = max(1, int(num_partitions))            # leading parallel axis (2 TCs on v7x)
    npc = -(-n_tiles // NC)                     # tiles per partition
    Bp = NC * npc * TB                          # label padding only (tiny)

    # Only the tiny label vector is padded (fill -1 -> zero one-hot column);
    # the big scores array streams unpadded straight from HBM.
    y_p = jnp.full((1, Bp), -1, dtype=jnp.int32)
    y_p = y_p.at[0, :B].set(jnp.asarray(y, jnp.int32).reshape(-1))

    def y_map(c, k):
        return (0, c * npc + k)

    def s_map(c, k):
        # Clamp so a partition's spill-over tiles never start a DMA fully past
        # B; the duplicated rows carry -1 labels, so they contribute nothing.
        return (jnp.minimum(c * npc + k, n_tiles - 1), 0)

    cm_parts = pl.pallas_call(
        _hcc_kernel,
        grid=(NC, npc),
        out_shape=jax.ShapeDtypeStruct((NC, C, C), jnp.float32),
        in_specs=[
            pl.BlockSpec((1, TB), y_map),
            pl.BlockSpec((TB, C), s_map),
        ],
        out_specs=pl.BlockSpec((None, C, C), lambda c, k: (c, 0, 0)),
        compiler_params=pltpu.CompilerParams(
            dimension_semantics=("parallel", "arbitrary"),
            vmem_limit_bytes=48 * 1024 * 1024,
        ),
        cost_estimate=pl.CostEstimate(
            flops=2 * Bp * C * C,
            transcendentals=0,
            bytes_accessed=B * C * 4 + Bp * 4 + NC * C * C * 4,
        ),
    )(y_p, scores)

    # Tiny (C, C) epilogue: sum per-core partials, zero the diagonal, take the
    # per-column (dim=0) max value + first-index argmax.
    cm = jnp.sum(cm_parts, axis=0)
    masked = cm * (1.0 - jnp.eye(C, dtype=cm.dtype))
    entry = jnp.max(masked, axis=0)
    idx = jnp.argmax(masked, axis=0).astype(jnp.int32)
    return masked, entry, idx


# ----- host-side glue replicating HCC.rearrange_max_to_last / get_pairs_for_MMD -----

def _rearrange_max_to_last(entry, idx, k_corr):
    entry = np.asarray(entry).reshape(-1)
    idx = np.asarray(idx).reshape(-1)

    unique_idx, counts = np.unique(idx, return_counts=True)
    # sort by count (descending)
    order = np.argsort(-counts, kind="stable")
    unique_idx = unique_idx[order]

    totals = []
    for value in unique_idx:
        locs = np.where(idx == value)[0]
        totals.append(float(entry[locs].sum()))
    totals = np.asarray(totals)

    # sort by number of highly-confused samples (descending)
    order2 = np.argsort(-totals, kind="stable")
    unique_idx = unique_idx[order2]
    return unique_idx[:k_corr]


def _get_pairs_for_MMD(ranked_corr_classes, num_class, k_corr):
    classes = list(range(num_class))
    hold_pairs = []
    for i, each in enumerate(ranked_corr_classes):
        each = int(each)
        num_mmd_pairs = k_corr - i - 1
        mmd_pairs = [each] * num_mmd_pairs
        classes.remove(each)
        hold_pairs.append(list(zip(mmd_pairs, classes)))
    return list(itertools.chain(*hold_pairs))


def hcc_forward(y, scores, num_class, k_corr):
    """Full HCC.forward: Pallas kernel for the dense work + host glue."""
    masked_cm, entry, idx = hcc_pallas_core(y, scores)
    jax.block_until_ready((masked_cm, entry, idx))
    ranked = _rearrange_max_to_last(entry, idx, k_corr)
    return _get_pairs_for_MMD(ranked, num_class, k_corr)


if __name__ == "__main__":
    NUM_CLASS = 16
    K_CORR = 4
    BATCH = 32

    key = jax.random.PRNGKey(0)
    k_y, k_s = jax.random.split(key)
    y = jax.random.randint(k_y, (BATCH,), 0, NUM_CLASS, dtype=jnp.int32)
    scores = jax.random.normal(k_s, (BATCH, NUM_CLASS), dtype=jnp.float32)

    pairs = hcc_forward(y, scores, NUM_CLASS, K_CORR)

    # sanity: pairs is a list of (hcc_class, other_class) tuples
    assert isinstance(pairs, list)
    assert all(isinstance(p, tuple) and len(p) == 2 for p in pairs)

    print("KERNEL_OK")
</pallas_src>

<mosaic_0001>
module attributes {stable_mosaic.version = 11 : i64} {
  func.func @_hcc_kernel(%arg0: i32, %arg1: i32, %arg2: memref<1x128xi32, #tpu.memory_space<vmem>>, %arg3: memref<128x16xf32, #tpu.memory_space<vmem>>, %arg4: memref<1x16x16xf32, #tpu.memory_space<vmem>>) attributes {dimension_semantics = [#tpu.dimension_semantics<parallel>, #tpu.dimension_semantics<arbitrary>], iteration_bounds = array<i64: 2, 1>, scalar_prefetch = 0 : i64, scratch_operands = 0 : i64, tpu.core_type = #tpu.core_type<tc>, window_params = [{transform_indices = @transform_0, window_bounds = array<i64: 1, 128>}, {transform_indices = @transform_1, window_bounds = array<i64: 128, 16>}, {transform_indices = @transform_2, window_bounds = array<i64: 1, 16, 16>}]} {
    %c0_i32 = arith.constant 0 : i32
    %0 = arith.cmpi eq, %arg1, %c0_i32 : i32
    %1 = arith.extui %0 : i1 to i32
    %c0_i32_0 = arith.constant 0 : i32
    %2 = arith.cmpi ne, %1, %c0_i32_0 : i32
    scf.if %2 {
      %cst_12 = arith.constant 0.000000e+00 : f32
      %32 = vector.broadcast %cst_12 : f32 to vector<16x16xf32>
      %c0_13 = arith.constant 0 : index
      %c0_14 = arith.constant 0 : index
      %c0_15 = arith.constant 0 : index
      %33 = vector.load %arg4[%c0_13, %c0_14, %c0_15] : memref<1x16x16xf32, #tpu.memory_space<vmem>>, vector<1x16x16xf32>
      %34 = vector.shape_cast %33 : vector<1x16x16xf32> to vector<16x16xf32>
      %35 = vector.shape_cast %32 : vector<16x16xf32> to vector<1x16x16xf32>
      tpu.vector_store %arg4[%c0_13, %c0_14, %c0_15], %35 {strides = array<i32>} : memref<1x16x16xf32, #tpu.memory_space<vmem>>, vector<1x16x16xf32>,
    } else {
    }
    %c0 = arith.constant 0 : index
    %c0_1 = arith.constant 0 : index
    %3 = vector.load %arg3[%c0, %c0_1] : memref<128x16xf32, #tpu.memory_space<vmem>>, vector<128x16xf32>
    %c0_2 = arith.constant 0 : index
    %c0_3 = arith.constant 0 : index
    %4 = vector.load %arg2[%c0_2, %c0_3] : memref<1x128xi32, #tpu.memory_space<vmem>>, vector<1x128xi32>
    %5 = tpu.iota {dimensions = array<i32: 1>} : vector<128x16xi32>
    %cst = arith.constant dense<0xFF800000> : vector<128xf32>
    %6 = vector.multi_reduction <maximumf>, %3, %cst [1] : vector<128x16xf32> to vector<128xf32>
    %7 = vector.shape_cast %6 : vector<128xf32> to vector<128x1xf32>
    %8 = vector.broadcast %7 : vector<128x1xf32> to vector<128x16xf32>
    %9 = arith.cmpf oeq, %3, %8 : vector<128x16xf32>
    %c16_i32 = arith.constant 16 : i32
    %10 = vector.broadcast %c16_i32 : i32 to vector<128x16xi32>
    %11 = arith.select %9, %5, %10 : vector<128x16xi1>, vector<128x16xi32>
    %cst_4 = arith.constant dense<2147483647> : vector<128xi32>
    %12 = vector.multi_reduction <minsi>, %11, %cst_4 [1] : vector<128x16xi32> to vector<128xi32>
    %13 = vector.shape_cast %12 : vector<128xi32> to vector<128x1xi32>
    %14 = vector.broadcast %13 : vector<128x1xi32> to vector<128x16xi32>
    %15 = arith.cmpi eq, %5, %14 : vector<128x16xi32>
    %16 = arith.extui %15 : vector<128x16xi1> to vector<128x16xi32>
    %17 = arith.sitofp %16 : vector<128x16xi32> to vector<128x16xf32>
    %18 = arith.truncf %17 : vector<128x16xf32> to vector<128x16xbf16>
    %19 = tpu.iota {dimensions = array<i32: 0>} : vector<16x128xi32>
    %20 = vector.broadcast %4 : vector<1x128xi32> to vector<16x128xi32>
    %21 = arith.cmpi eq, %19, %20 : vector<16x128xi32>
    %22 = arith.extui %21 : vector<16x128xi1> to vector<16x128xi32>
    %23 = arith.sitofp %22 : vector<16x128xi32> to vector<16x128xf32>
    %24 = arith.truncf %23 : vector<16x128xf32> to vector<16x128xbf16>
    %c0_5 = arith.constant 0 : index
    %c0_6 = arith.constant 0 : index
    %c0_7 = arith.constant 0 : index
    %25 = vector.load %arg4[%c0_5, %c0_6, %c0_7] : memref<1x16x16xf32, #tpu.memory_space<vmem>>, vector<1x16x16xf32>
    %26 = vector.shape_cast %25 : vector<1x16x16xf32> to vector<16x16xf32>
    %cst_8 = arith.constant dense<0.000000e+00> : vector<16x16xf32>
    %27 = tpu.matmul %24, %18, %cst_8 {dimension_numbers = #tpu.dot_dimension_numbers<[1], [0], [0], [1], [0, 0, 1, 1], [], []>} : vector<16x128xbf16>, vector<128x16xbf16>, vector<16x16xf32> -> vector<16x16xf32>
    %28 = arith.addf %26, %27 : vector<16x16xf32>
    %c0_9 = arith.constant 0 : index
    %c0_10 = arith.constant 0 : index
    %c0_11 = arith.constant 0 : index
    %29 = vector.load %arg4[%c0_9, %c0_10, %c0_11] : memref<1x16x16xf32, #tpu.memory_space<vmem>>, vector<1x16x16xf32>
    %30 = vector.shape_cast %29 : vector<1x16x16xf32> to vector<16x16xf32>
    %31 = vector.shape_cast %28 : vector<16x16xf32> to vector<1x16x16xf32>
    tpu.vector_store %arg4[%c0_9, %c0_10, %c0_11], %31 {strides = array<i32>} : memref<1x16x16xf32, #tpu.memory_space<vmem>>, vector<1x16x16xf32>,
    return
  }
  func.func @transform_0(%arg0: i32, %arg1: i32) -> (i32, i32) {
    %c1_i32 = arith.constant 1 : i32
    %0 = arith.muli %arg0, %c1_i32 : i32
    %1 = arith.addi %0, %arg1 : i32
    %c0_i32 = arith.constant 0 : i32
    %c0_i32_0 = arith.constant 0 : i32
    return %c0_i32, %1 : i32, i32
  }
  func.func @transform_1(%arg0: i32, %arg1: i32) -> (i32, i32) {
    %c1_i32 = arith.constant 1 : i32
    %0 = arith.muli %arg0, %c1_i32 : i32
    %1 = arith.addi %0, %arg1 : i32
    %c0_i32 = arith.constant 0 : i32
    %2 = arith.minsi %1, %c0_i32 : i32
    %c0_i32_0 = arith.constant 0 : i32
    %c0_i32_1 = arith.constant 0 : i32
    return %2, %c0_i32_0 : i32, i32
  }
  func.func @transform_2(%arg0: i32, %arg1: i32) -> (i32, i32, i32) {
    %c0_i32 = arith.constant 0 : i32
    %c0_i32_0 = arith.constant 0 : i32
    %c0_i32_1 = arith.constant 0 : i32
    return %arg0, %c0_i32, %c0_i32_0 : i32, i32, i32
  }
}

</mosaic_0001>

<bundles_post_ra>
// kernel: hcc_pallas_core.1
= control target key start
LH: loop header
LB: loop body
LE: loop exit
PB: predicated region body
PF: predicated region fallthrough
CT: control target
= control target key end

     0   :  { %s894_s9 = smov 0   ;;  %s896_s10 = smov 0   ;;  %s1302_s0 = inlined_call_operand.vmem [shape: s32[1,256], index: 0, kind: input, shape index: {}]   ;;  %s1303_s1 = inlined_call_operand.vmem [shape: f32[32,16], index: 1, kind: input, shape index: {}]   ;;  %s1304_s2 = inlined_call_operand.vmem [shape: f32[2,16,16], index: 2, kind: output, shape index: {}]  }
   0x1   :  { %s898_s11 = smov 0  }
   0x2 LB: > { %s24_s12 = sadd.s32 1, %s870_s10  ;;  %p751_p0 = scmp.ge.s32.totalorder %s874_s11, 1  ;;  %s874_s11 = sphi %s898_s11, %s12_s11   ;;  %s870_s10 = sphi %s896_s10, %s1306_s10   ;;  %s866_s9 = sphi %s894_s9, %s1305_s9  }
   0x3   : > { %p26_p1 = scmp.ge.s32.totalorder %s24_s12, 2  ;;  %p153_p2 = scmp.lt.s32.totalorder %s874_s11, 3 }
   0x5   : > { %s1308_s12 = smov (%p26_p1, %s24_s12), 0  ;;  %p154_p3 = pnand %p751_p0, %p153_p2 }
   0x6   : > { %p190_p4 = scmp.lt.s32.totalorder (!%p154_p3), %s866_s9, 0  ;;  %vm215_vm0 = vcmask (!%p154_p3), 130048   ;;  %v235_v32 = vlaneseq (!%p154_p3)  ;;  %p185_p6 = scmp.lt.s32.totalorder (!%p154_p3), %s866_s9, 1 }
   0x7   : > { %157 = sbr.rel (%p154_p3) target bundleno = 717 (0x2cd), region = 28 }
   0x8   : > { %v993_v33 = vand.u32 (!%p154_p3), 127, %v235_v32 }
   0xe   : > { %s191_s13 = scalar_select %p190_p4, %s866_s9, 0 }
   0xf   : > { %s1312_s9 = smov (!%p185_p6, %s866_s9), 1 }
  0x10   : > { %s752_s14 = sshll.u32 %s191_s13, 4  ;;  %s795_s19 = sshll.u32 %s1312_s9, 4 }
  0x11   : > { %p195_p5 = scmp.lt.s32.totalorder %s752_s14, 3  ;;  %s1226_s22 = scalar_lea.vmem %s1304_s2, %s795_s19 }
  0x12   : > { %s187_s25 = scalar_lea.vmem %s1302_s0, %s1312_s9 }
  0x13   : > { %s1310_s14 = smov (!%p195_p5, %s752_s14), 3 }
  0x14   : > { %s753_s15 = sshll.u32 %s1310_s14, 3 }
  0x15   : > { %s919_s18 = scalar_lea.vmem %s1303_s1, %s753_s15 }
  0x16   : > { %v218_v0 = vld [vmem:[%s919_s18] sm:$0xff]  ;;  %v220_v1 = vld [vmem:[%s919_s18 + $0x10] sm:$0xff]  ;;  %v924_v2 = vld [vmem:[%s919_s18 + $0x8] sm:$0xff] }
  0x17   : > { %v238_v3 = vsel %vm215_vm0, %v218_v0, -inf  ;;  %v244_v4 = vsel %vm215_vm0, %v220_v1, -inf  ;;  %v221_v5 = vld [vmem:[%s919_s18 + $0x18] sm:$0xff]  ;;  %v241_v6 = vsel %vm215_vm0, %v924_v2, -inf  ;;  %v933_v8 = vld [vmem:[%s919_s18 + $0x20] sm:$0xff]  ;;  %v936_v9 = vld [vmem:[%s919_s18 + $0x28] sm:$0xff] }
  0x18   : > { %239 = vmax.xlane.f32.xlu0 %v238_v3  ;;  %245 = vmax.xlane.f32.xlu1 %v244_v4  ;;  %v247_v7 = vsel %vm215_vm0, %v221_v5, -inf  ;;  %v250_v10 = vsel %vm215_vm0, %v933_v8, -inf  ;;  %v253_v11 = vsel %vm215_vm0, %v936_v9, -inf  ;;  %v943_v12 = vld [vmem:[%s919_s18 + $0x30] sm:$0xff]  ;;  %v946_v13 = vld [vmem:[%s919_s18 + $0x38] sm:$0xff]  ;;  %v953_v16 = vld [vmem:[%s919_s18 + $0x40] sm:$0xff] }
  0x19   : > { %v256_v14 = vsel %vm215_vm0, %v943_v12, -inf  ;;  %v259_v15 = vsel %vm215_vm0, %v946_v13, -inf  ;;  %v956_v17 = vld [vmem:[%s919_s18 + $0x48] sm:$0xff]  ;;  %v262_v18 = vsel %vm215_vm0, %v953_v16, -inf  ;;  %v963_v20 = vld [vmem:[%s919_s18 + $0x50] sm:$0xff]  ;;  %v966_v21 = vld [vmem:[%s919_s18 + $0x58] sm:$0xff] }
  0x1a   : > { %v265_v19 = vsel %vm215_vm0, %v956_v17, -inf  ;;  %v268_v22 = vsel %vm215_vm0, %v963_v20, -inf  ;;  %v271_v23 = vsel %vm215_vm0, %v966_v21, -inf  ;;  %v973_v24 = vld [vmem:[%s919_s18 + $0x60] sm:$0xff]  ;;  %v976_v25 = vld [vmem:[%s919_s18 + $0x68] sm:$0xff]  ;;  %v983_v28 = vld [vmem:[%s919_s18 + $0x70] sm:$0xff] }
  0x1b   : > { %v274_v26 = vsel %vm215_vm0, %v973_v24, -inf  ;;  %v277_v27 = vsel %vm215_vm0, %v976_v25, -inf  ;;  %v986_v29 = vld [vmem:[%s919_s18 + $0x78] sm:$0xff]  ;;  %v280_v30 = vsel %vm215_vm0, %v983_v28, -inf }
  0x1c   : > { %242 = vmax.xlane.f32.xlu0 %v241_v6  ;;  %248 = vmax.xlane.f32.xlu1 %v247_v7  ;;  %v283_v31 = vsel %vm215_vm0, %v986_v29, -inf }
  0x20   : > { %251 = vmax.xlane.f32.xlu0 %v250_v10  ;;  %254 = vmax.xlane.f32.xlu1 %v253_v11 }
  0x24   : > { %257 = vmax.xlane.f32.xlu0 %v256_v14  ;;  %260 = vmax.xlane.f32.xlu1 %v259_v15 }
  0x28   : > { %263 = vmax.xlane.f32.xlu0 %v262_v18  ;;  %266 = vmax.xlane.f32.xlu1 %v265_v19 }
  0x2c   : > { %269 = vmax.xlane.f32.xlu0 %v268_v22  ;;  %272 = vmax.xlane.f32.xlu1 %v271_v23 }
  0x30   : > { %275 = vmax.xlane.f32.xlu0 %v274_v26  ;;  %278 = vmax.xlane.f32.xlu1 %v277_v27 }
  0x34   : > { %281 = vmax.xlane.f32.xlu0 %v280_v30  ;;  %284 = vmax.xlane.f32.xlu1 %v283_v31 }
  0xa5   : > { %v240_v34 = vpop.xlane.xlu0 %239  ;;  %v246_v35 = vpop.xlane.xlu1 %245 }
  0xa6   : > { %vm286_vm1 = vcmp.eq.f32.partialorder %v218_v0, %v240_v34  ;;  %vm288_vm2 = vcmp.eq.f32.partialorder %v220_v1, %v246_v35 }
  0xa7   : > { %v302_v36 = vsel %vm286_vm1, %v993_v33, 16  ;;  %v304_v37 = vsel %vm288_vm2, %v993_v33, 16 }
  0xa8   : > { %v998_v38 = vsel %vm215_vm0, %v302_v36, 2147483647  ;;  %v1001_v39 = vsel %vm215_vm0, %v304_v37, 2147483647 }
  0xa9   : > { %v243_v40 = vpop.xlane.xlu0 %242  ;;  %v249_v41 = vpop.xlane.xlu1 %248  ;;  %v320_v42 = vshra.s32 %v998_v38, 16  ;;  %v350_v43 = vshra.s32 %v1001_v39, 16 }
  0xaa   : > { %vm287_vm3 = vcmp.eq.f32.partialorder %v924_v2, %v243_v40  ;;  %vm289_vm4 = vcmp.eq.f32.partialorder %v221_v5, %v249_v41 }
  0xab   : > { %v303_v44 = vsel %vm287_vm3, %v993_v33, 16  ;;  %v305_v45 = vsel %vm289_vm4, %v993_v33, 16  ;;  %v1008_v46 = vcvt.s32.f32 %v320_v42  ;;  %v1017_v51 = vcvt.s32.f32 %v350_v43 }
  0xac   : > { %v1011_v47 = vsel %vm215_vm0, %v303_v44, 2147483647  ;;  %v1014_v48 = vsel %vm215_vm0, %v305_v45, 2147483647 }
  0xad   : > { %323 = vmin.xlane.f32.xlu0 %v1008_v46  ;;  %v252_v49 = vpop.xlane.xlu0 %251  ;;  %v255_v50 = vpop.xlane.xlu1 %254  ;;  %v335_v52 = vshra.s32 %v1011_v47, 16  ;;  %v365_v53 = vshra.s32 %v1014_v48, 16 }
  0xae   : > { %vm290_vm5 = vcmp.eq.f32.partialorder %v933_v8, %v252_v49  ;;  %vm291_vm6 = vcmp.eq.f32.partialorder %v936_v9, %v255_v50 }
  0xaf   : > { %v306_v54 = vsel %vm290_vm5, %v993_v33, 16  ;;  %v307_v55 = vsel %vm291_vm6, %v993_v33, 16  ;;  %v1025_v56 = vcvt.s32.f32 %v335_v52  ;;  %v1035_v61 = vcvt.s32.f32 %v365_v53 }
  0xb0   : > { %v1028_v57 = vsel %vm215_vm0, %v306_v54, 2147483647  ;;  %v1031_v58 = vsel %vm215_vm0, %v307_v55, 2147483647 }
  0xb1   : > { %353 = vmin.xlane.f32.xlu0 %v1017_v51  ;;  %338 = vmin.xlane.f32.xlu1 %v1025_v56  ;;  %v258_v59 = vpop.xlane.xlu0 %257  ;;  %v261_v60 = vpop.xlane.xlu1 %260  ;;  %v380_v62 = vshra.s32 %v1028_v57, 16  ;;  %v395_v63 = vshra.s32 %v1031_v58, 16 }
  0xb2   : > { %vm292_vm7 = vcmp.eq.f32.partialorder %v943_v12, %v258_v59  ;;  %vm293_vm8 = vcmp.eq.f32.partialorder %v946_v13, %v261_v60 }
  0xb3   : > { %v308_v0 = vsel %vm292_vm7, %v993_v33, 16  ;;  %v309_v1 = vsel %vm293_vm8, %v993_v33, 16  ;;  %v1043_v2 = vcvt.s32.f32 %v380_v62  ;;  %v1053_v7 = vcvt.s32.f32 %v395_v63 }
  0xb4   : > { %v1046_v3 = vsel %vm215_vm0, %v308_v0, 2147483647  ;;  %v1049_v4 = vsel %vm215_vm0, %v309_v1, 2147483647  ;;  %v319_v62 = vand.u32 65535, %v998_v38  ;;  %v334_v1 = vand.u32 65535, %v1011_v47 }
  0xb5   : > { %368 = vmin.xlane.f32.xlu1 %v1035_v61  ;;  %383 = vmin.xlane.f32.xlu0 %v1043_v2  ;;  %v264_v5 = vpop.xlane.xlu0 %263  ;;  %v267_v6 = vpop.xlane.xlu1 %266  ;;  %v410_v8 = vshra.s32 %v1046_v3, 16  ;;  %v425_v9 = vshra.s32 %v1049_v4, 16  ;;  %v364_v38 = vand.u32 65535, %v1014_v48  ;;  %v394_v48 = vand.u32 65535, %v1031_v58 }
  0xb6   : > { %vm294_vm9 = vcmp.eq.f32.partialorder %v953_v16, %v264_v5  ;;  %vm295_vm10 = vcmp.eq.f32.partialorder %v956_v17, %v267_v6  ;;  %v321_v0 = vcvt.s32.f32 %v319_v62  ;;  %v349_v5 = vand.u32 65535, %v1001_v39 }
  0xb7   : > { %v310_v10 = vsel %vm294_vm9, %v993_v33, 16  ;;  %v311_v11 = vsel %vm295_vm10, %v993_v33, 16  ;;  %v1061_v12 = vcvt.s32.f32 %v410_v8  ;;  %v1071_v18 = vcvt.s32.f32 %v425_v9 }
  0xb8   : > { %v1064_v13 = vsel %vm215_vm0, %v310_v10, 2147483647  ;;  %v1067_v14 = vsel %vm215_vm0, %v311_v11, 2147483647  ;;  %v336_v10 = vcvt.s32.f32 %v334_v1  ;;  %v351_v11 = vcvt.s32.f32 %v349_v5 }
  0xb9   : > { %398 = vmin.xlane.f32.xlu1 %v1053_v7  ;;  %413 = vmin.xlane.f32.xlu0 %v1061_v12  ;;  %v270_v15 = vpop.xlane.xlu0 %269  ;;  %v273_v16 = vpop.xlane.xlu1 %272  ;;  %v440_v17 = vshra.s32 %v1064_v13, 16  ;;  %v455_v19 = vshra.s32 %v1067_v14, 16  ;;  %v424_v58 = vand.u32 65535, %v1049_v4  ;;  %v454_v4 = vand.u32 65535, %v1067_v14 }
  0xba   : > { %vm296_vm11 = vcmp.eq.f32.partialorder %v963_v20, %v270_v15  ;;  %vm297_vm12 = vcmp.eq.f32.partialorder %v966_v21, %v273_v16  ;;  %v379_v15 = vand.u32 65535, %v1028_v57  ;;  %v409_v57 = vand.u32 65535, %v1046_v3 }
  0xbb   : > { %v312_v22 = vsel %vm296_vm11, %v993_v33, 16  ;;  %v313_v23 = vsel %vm297_vm12, %v993_v33, 16  ;;  %v1079_v26 = vcvt.s32.f32 %v440_v17  ;;  %v1089_v34 = vcvt.s32.f32 %v455_v19 }
  0xbc   : > { %v1082_v27 = vsel %vm215_vm0, %v312_v22, 2147483647  ;;  %v1085_v30 = vsel %vm215_vm0, %v313_v23, 2147483647  ;;  %v366_v17 = vcvt.s32.f32 %v364_v38  ;;  %v381_v19 = vcvt.s32.f32 %v379_v15 }
  0xbd   : > { %428 = vmin.xlane.f32.xlu1 %v1071_v18  ;;  %443 = vmin.xlane.f32.xlu0 %v1079_v26  ;;  %v276_v31 = vpop.xlane.xlu0 %275  ;;  %v279_v20 = vpop.xlane.xlu1 %278  ;;  %v470_v21 = vshra.s32 %v1082_v27, 16  ;;  %v485_v35 = vshra.s32 %v1085_v30, 16  ;;  %v439_v3 = vand.u32 65535, %v1064_v13  ;;  %v469_v13 = vand.u32 65535, %v1082_v27 }
  0xbe   : > { %vm298_vm13 = vcmp.eq.f32.partialorder %v973_v24, %v276_v31  ;;  %vm299_vm14 = vcmp.eq.f32.partialorder %v976_v25, %v279_v20  ;;  %v396_v31 = vcvt.s32.f32 %v394_v48  ;;  %v411_v20 = vcvt.s32.f32 %v409_v57 }
  0xbf   : > { %v314_v36 = vsel %vm298_vm13, %v993_v33, 16  ;;  %v315_v37 = vsel %vm299_vm14, %v993_v33, 16  ;;  %v1097_v40 = vcvt.s32.f32 %v470_v21  ;;  %v1107_v44 = vcvt.s32.f32 %v485_v35 }
  0xc0   : > { %v1100_v41 = vsel %vm215_vm0, %v314_v36, 2147483647  ;;  %v1103_v42 = vsel %vm215_vm0, %v315_v37, 2147483647  ;;  %v426_v36 = vcvt.s32.f32 %v424_v58  ;;  %v441_v37 = vcvt.s32.f32 %v439_v3 }
  0xc1   : > { %458 = vmin.xlane.f32.xlu1 %v1089_v34  ;;  %473 = vmin.xlane.f32.xlu0 %v1097_v40  ;;  %v282_v43 = vpop.xlane.xlu0 %281  ;;  %v285_v24 = vpop.xlane.xlu1 %284  ;;  %v500_v25 = vshra.s32 %v1100_v41, 16  ;;  %v515_v45 = vshra.s32 %v1103_v42, 16  ;;  %v484_v14 = vand.u32 65535, %v1085_v30  ;;  %v499_v27 = vand.u32 65535, %v1100_v41 }
  0xc2   : > { %vm300_vm15 = vcmp.eq.f32.partialorder %v983_v28, %v282_v43  ;;  %vm301_vm1 = vcmp.eq.f32.partialorder %v986_v29, %v285_v24  ;;  %v514_v30 = vand.u32 65535, %v1103_v42 }
  0xc3   : > { %v316_v49 = vsel %vm300_vm15, %v993_v33, 16  ;;  %v317_v50 = vsel %vm301_vm1, %v993_v33, 16  ;;  %v1115_v52 = vcvt.s32.f32 %v500_v25  ;;  %v1125_v55 = vcvt.s32.f32 %v515_v45 }
  0xc4   : > { %v1118_v53 = vsel %vm215_vm0, %v316_v49, 2147483647  ;;  %v1121_v54 = vsel %vm215_vm0, %v317_v50, 2147483647  ;;  %v456_v25 = vcvt.s32.f32 %v454_v4  ;;  %v471_v45 = vcvt.s32.f32 %v469_v13 }
  0xc5   : > { %488 = vmin.xlane.f32.xlu1 %v1107_v44  ;;  %503 = vmin.xlane.f32.xlu0 %v1115_v52  ;;  %v530_v28 = vshra.s32 %v1118_v53, 16  ;;  %v545_v29 = vshra.s32 %v1121_v54, 16  ;;  %v529_v41 = vand.u32 65535, %v1118_v53  ;;  %v516_v1 = vcvt.s32.f32 %v514_v30 }
  0xc6   : > { %v544_v42 = vand.u32 65535, %v1121_v54  ;;  %v876_v53 = vmov 0.0   ;;  %v878_v4 = vmov 1.0|1.0  }
  0xc7   : > { %v1129_v59 = vcvt.s32.f32 %v530_v28  ;;  %v1133_v60 = vcvt.s32.f32 %v545_v29  ;;  %v486_v28 = vcvt.s32.f32 %v484_v14  ;;  %v501_v29 = vcvt.s32.f32 %v499_v27  ;;  %805 = vmatprep.subr.bf16.mxu0 %v876_v53  ;;  %216 = vst.msk [vmem:[%s1226_s22] sm:$0xff] %vm215_vm0, %v876_v53  ;;  %217 = vst.msk [vmem:[%s1226_s22 + $0x8] sm:$0xff] %vm215_vm0, %v876_v53 }
  0xc8   : > { %v531_v5 = vcvt.s32.f32 %v529_v41 }
  0xc9   : > { %518 = vmin.xlane.f32.xlu1 %v1125_v55  ;;  %533 = vmin.xlane.f32.xlu0 %v1129_v59 }
  0xcd   : > { %548 = vmin.xlane.f32.xlu1 %v1133_v60 }
 0x13a   : > { %v1137_v63 = vpop.xlane.xlu0 %323 }
 0x13b   : > { %vm325_vm2 = vcmp.eq.f32.partialorder %v1008_v46, %v1137_v63 }
 0x13c   : > { %v326_v6 = vsel %vm325_vm2, %v321_v0, inf }
 0x13d   : > { %327 = vmin.xlane.f32.xlu0 %v326_v6 }
 0x13e   : > { %v1143_v8 = vpop.xlane.xlu1 %338  ;;  %v1145_v9 = vpop.xlane.xlu0 %353 }
 0x13f   : > { %vm340_vm3 = vcmp.eq.f32.partialorder %v1025_v56, %v1143_v8  ;;  %vm355_vm4 = vcmp.eq.f32.partialorder %v1017_v51, %v1145_v9  ;;  %v360_v38 = vcvt.f32.s32 %v1145_v9 }
 0x140   : > { %v341_v39 = vsel %vm340_vm3, %v336_v10, inf  ;;  %v356_v46 = vsel %vm355_vm4, %v351_v11, inf  ;;  %v546_v10 = vcvt.s32.f32 %v544_v42  ;;  %vm877_vm3 = vmmov 0  }
 0x141   : > { %342 = vmin.xlane.f32.xlu1 %v341_v39  ;;  %357 = vmin.xlane.f32.xlu0 %v356_v46 }
 0x142   : > { %v1153_v47 = vpop.xlane.xlu1 %368  ;;  %v1155_v16 = vpop.xlane.xlu0 %383  ;;  %821 = vmatprep.mubr.msk.bf16.mxu0 %vm877_vm3, %v876_v53 }
 0x143   : > { %vm370_vm5 = vcmp.eq.f32.partialorder %v1035_v61, %v1153_v47  ;;  %vm385_vm6 = vcmp.eq.f32.partialorder %v1043_v2, %v1155_v16  ;;  %v375_v39 = vcvt.f32.s32 %v1153_v47 }
 0x144   : > { %v371_v51 = vsel %vm370_vm5, %v366_v17, inf  ;;  %v386_v56 = vsel %vm385_vm6, %v381_v19, inf }
 0x145   : > { %372 = vmin.xlane.f32.xlu1 %v371_v51  ;;  %387 = vmin.xlane.f32.xlu0 %v386_v56  ;;  %v361_v56 = vshll.u32 %v360_v38, 16 }
 0x146   : > { %v1163_v22 = vpop.xlane.xlu1 %398  ;;  %v1165_v23 = vpop.xlane.xlu0 %413 }
 0x147   : > { %vm400_vm7 = vcmp.eq.f32.partialorder %v1053_v7, %v1163_v22  ;;  %vm415_vm8 = vcmp.eq.f32.partialorder %v1061_v12, %v1165_v23  ;;  %v405_v58 = vcvt.f32.s32 %v1163_v22  ;;  %v420_v47 = vcvt.f32.s32 %v1165_v23 }
 0x148   : > { %v401_v61 = vsel %vm400_vm7, %v396_v31, inf  ;;  %v416_v2 = vsel %vm415_vm8, %v411_v20, inf  ;;  %v390_v31 = vcvt.f32.s32 %v1155_v16 }
 0x149   : > { %402 = vmin.xlane.f32.xlu1 %v401_v61  ;;  %417 = vmin.xlane.f32.xlu0 %v416_v2  ;;  %v406_v16 = vshll.u32 %v405_v58, 16  ;;  %v421_v23 = vshll.u32 %v420_v47, 16 }
 0x14a   : > { %v1173_v21 = vpop.xlane.xlu1 %428  ;;  %v1175_v35 = vpop.xlane.xlu0 %443 }
 0x14b   : > { %vm430_vm9 = vcmp.eq.f32.partialorder %v1071_v18, %v1173_v21  ;;  %vm445_vm10 = vcmp.eq.f32.partialorder %v1079_v26, %v1175_v35  ;;  %v435_v22 = vcvt.f32.s32 %v1173_v21  ;;  %v450_v14 = vcvt.f32.s32 %v1175_v35 }
 0x14c   : > { %v431_v7 = vsel %vm430_vm9, %v426_v36, inf  ;;  %v446_v12 = vsel %vm445_vm10, %v441_v37, inf  ;;  %v391_v36 = vshll.u32 %v390_v31, 16 }
 0x14d   : > { %432 = vmin.xlane.f32.xlu1 %v431_v7  ;;  %447 = vmin.xlane.f32.xlu0 %v446_v12  ;;  %v451_v35 = vshll.u32 %v450_v14, 16 }
 0x14e   : > { %v1183_v43 = vpop.xlane.xlu1 %458  ;;  %v1185_v24 = vpop.xlane.xlu0 %473 }
 0x14f   : > { %vm460_vm11 = vcmp.eq.f32.partialorder %v1089_v34, %v1183_v43  ;;  %vm475_vm12 = vcmp.eq.f32.partialorder %v1097_v40, %v1185_v24  ;;  %v465_v21 = vcvt.f32.s32 %v1183_v43 }
 0x150   : > { %v461_v18 = vsel %vm460_vm11, %v456_v25, inf  ;;  %v476_v26 = vsel %vm475_vm12, %v471_v45, inf }
 0x151   : > { %462 = vmin.xlane.f32.xlu1 %v461_v18  ;;  %477 = vmin.xlane.f32.xlu0 %v476_v26  ;;  %v436_v18 = vshll.u32 %v435_v22, 16 }
 0x152   : > { %v1193_v49 = vpop.xlane.xlu1 %488  ;;  %v1195_v50 = vpop.xlane.xlu0 %503 }
 0x153   : > { %vm490_vm13 = vcmp.eq.f32.partialorder %v1107_v44, %v1193_v49  ;;  %vm505_vm14 = vcmp.eq.f32.partialorder %v1115_v52, %v1195_v50  ;;  %v495_v43 = vcvt.f32.s32 %v1193_v49 }
 0x154   : > { %v491_v34 = vsel %vm490_vm13, %v486_v28, inf  ;;  %v506_v40 = vsel %vm505_vm14, %v501_v29, inf }
 0x155   : > { %492 = vmin.xlane.f32.xlu1 %v491_v34  ;;  %507 = vmin.xlane.f32.xlu0 %v506_v40  ;;  %v480_v34 = vcvt.f32.s32 %v1185_v24 }
 0x156   : > { %v1203_v62 = vpop.xlane.xlu1 %518  ;;  %v1205_v0 = vpop.xlane.xlu0 %533 }
 0x157   : > { %vm520_vm15 = vcmp.eq.f32.partialorder %v1125_v55, %v1203_v62  ;;  %vm535_vm1 = vcmp.eq.f32.partialorder %v1129_v59, %v1205_v0  ;;  %v330_v55 = vcvt.f32.s32 %v1137_v63  ;;  %v376_v63 = vshll.u32 %v375_v39, 16 }
 0x158   : > { %v521_v44 = vsel %vm520_vm15, %v516_v1, inf  ;;  %v536_v52 = vsel %vm535_vm1, %v531_v5, inf  ;;  %v466_v1 = vshll.u32 %v465_v21, 16  ;;  %v481_v24 = vshll.u32 %v480_v34, 16 }
 0x159   : > { %522 = vmin.xlane.f32.xlu1 %v521_v44  ;;  %537 = vmin.xlane.f32.xlu0 %v536_v52  ;;  %v331_v15 = vshll.u32 %v330_v55, 16  ;;  %v525_v49 = vcvt.f32.s32 %v1203_v62 }
 0x15a   : > { %v1213_v6 = vpop.xlane.xlu1 %548 }
 0x15b   : > { %vm550_vm2 = vcmp.eq.f32.partialorder %v1133_v60, %v1213_v6  ;;  %v345_v60 = vcvt.f32.s32 %v1143_v8  ;;  %v526_v62 = vshll.u32 %v525_v49, 16 }
 0x15c   : > { %v551_v54 = vsel %vm550_vm2, %v546_v10, inf }
 0x15d   : > { %552 = vmin.xlane.f32.xlu1 %v551_v54  ;;  %v346_v19 = vshll.u32 %v345_v60, 16  ;;  %v510_v54 = vcvt.f32.s32 %v1195_v50  ;;  %v540_v50 = vcvt.f32.s32 %v1205_v0 }
 0x15f   : > { %v541_v0 = vshll.u32 %v540_v50, 16 }
 0x1ca   : > { %v328_v59 = vpop.xlane.xlu0 %327 }
 0x1cb   : > { %v329_v11 = vcvt.f32.s32 %v328_v59  ;;  %v496_v59 = vshll.u32 %v495_v43, 16 }
 0x1cd   : > { %v332_v48 = vadd.s32 %v331_v15, %v329_v11 }
 0x1ce   : > { %v343_v46 = vpop.xlane.xlu1 %342  ;;  %v358_v17 = vpop.xlane.xlu0 %357 }
 0x1cf   : > { %v344_v57 = vcvt.f32.s32 %v343_v46  ;;  %v359_v51 = vcvt.f32.s32 %v358_v17  ;;  %vm558_vm4 = vcmp.eq.s32.totalorder %v993_v33, %v332_v48  ;;  %v511_v46 = vshll.u32 %v510_v54, 16 }
 0x1d1   : > { %v347_v20 = vadd.s32 %v346_v19, %v344_v57  ;;  %v362_v8 = vadd.s32 %v361_v56, %v359_v51  ;;  %v555_v19 = vcvt.f32.s32 %v1213_v6  ;;  %v615_v51 = vshrl.u32 %v235_v32, 7 }
 0x1d2   : > { %v373_v3 = vpop.xlane.xlu1 %372  ;;  %v388_v61 = vpop.xlane.xlu0 %387 }
 0x1d3   : > { %v374_v9 = vcvt.f32.s32 %v373_v3  ;;  %v389_v2 = vcvt.f32.s32 %v388_v61  ;;  %vm559_vm5 = vcmp.eq.s32.totalorder %v993_v33, %v347_v20  ;;  %vm560_vm7 = vcmp.eq.s32.totalorder %v993_v33, %v362_v8  ;;  %v772_v61 = vld [vmem:[%s187_s25] ss:$0 sm:$0xff] }
 0x1d4   : > { %vm775_vm6 = vmpackc.low %vm559_vm5, %vm558_vm4  ;;  %v616_v8 = vadd.s32 8, %v615_v51 }
 0x1d5   : > { %v377_v37 = vadd.s32 %v376_v63, %v374_v9  ;;  %806 = vmatpush3.bf16.msk.msra.mxu0 %vm775_vm6, %v878_v4  ;;  %v392_v12 = vadd.s32 %v391_v36, %v389_v2  ;;  %v556_v63 = vshll.u32 %v555_v19, 16  ;;  %v628_v2 = vld [vmem:[%s1226_s22] sm:$0xff]  ;;  %v629_v36 = vld [vmem:[%s1226_s22 + $0x8] sm:$0xff] }
 0x1d6   : > { %v403_v13 = vpop.xlane.xlu1 %402  ;;  %v418_v7 = vpop.xlane.xlu0 %417  ;;  %807 = vmatprep.subr.bf16.mxu0 %v876_v53 }
 0x1d7   : > { %v404_v25 = vcvt.f32.s32 %v403_v13  ;;  %v419_v45 = vcvt.f32.s32 %v418_v7  ;;  %vm561_vm8 = vcmp.eq.s32.totalorder %v993_v33, %v377_v37  ;;  %vm562_vm10 = vcmp.eq.s32.totalorder %v993_v33, %v392_v12 }
 0x1d8   : > { %vm777_vm9 = vmpackc.low %vm561_vm8, %vm560_vm7 }
 0x1d9   : > { %v407_v27 = vadd.s32 %v406_v16, %v404_v25  ;;  %808 = vmatpush3.bf16.msk.msra.mxu0 %vm777_vm9, %v878_v4  ;;  %v422_v26 = vadd.s32 %v421_v23, %v419_v45 }
 0x1da   : > { %v433_v28 = vpop.xlane.xlu1 %432  ;;  %v448_v29 = vpop.xlane.xlu0 %447  ;;  %809 = vmatprep.subr.bf16.mxu0 %v876_v53 }
 0x1db   : > { %v434_v30 = vcvt.f32.s32 %v433_v28  ;;  %v449_v41 = vcvt.f32.s32 %v448_v29  ;;  %vm563_vm11 = vcmp.eq.s32.totalorder %v993_v33, %v407_v27  ;;  %vm564_vm13 = vcmp.eq.s32.totalorder %v993_v33, %v422_v26 }
 0x1dc   : > { %vm779_vm12 = vmpackc.low %vm563_vm11, %vm562_vm10  ;;  %vm621_vm10 = vcmp.eq.s32.totalorder %v615_v51, %v772_v61  ;;  %vm622_vm11 = vcmp.eq.s32.totalorder %v616_v8, %v772_v61 }
 0x1dd   : > { %v437_v40 = vadd.s32 %v436_v18, %v434_v30  ;;  %810 = vmatpush3.bf16.msk.msra.mxu0 %vm779_vm12, %v878_v4  ;;  %v452_v44 = vadd.s32 %v451_v35, %v449_v41 }
 0x1de   : > { %v463_v5 = vpop.xlane.xlu1 %462  ;;  %v478_v42 = vpop.xlane.xlu0 %477  ;;  %811 = vmatprep.subr.bf16.mxu0 %v876_v53 }
 0x1df   : > { %v464_v52 = vcvt.f32.s32 %v463_v5  ;;  %v479_v10 = vcvt.f32.s32 %v478_v42  ;;  %vm565_vm14 = vcmp.eq.s32.totalorder %v993_v33, %v437_v40  ;;  %vm566_vm1 = vcmp.eq.s32.totalorder %v993_v33, %v452_v44 }
 0x1e0   : > { %vm781_vm15 = vmpackc.low %vm565_vm14, %vm564_vm13 }
 0x1e1   : > { %v467_v55 = vadd.s32 %v466_v1, %v464_v52  ;;  %812 = vmatpush3.bf16.msk.msra.mxu0 %vm781_vm15, %v878_v4  ;;  %v482_v60 = vadd.s32 %v481_v24, %v479_v10  ;;  %vm791_vm15 = vmpackc.low %vm622_vm11, %vm621_vm10 }
 0x1e2   : > { %v493_v11 = vpop.xlane.xlu1 %492  ;;  %v508_v38 = vpop.xlane.xlu0 %507  ;;  %813 = vmatprep.subr.bf16.mxu0 %v876_v53 }
 0x1e3   : > { %v494_v15 = vcvt.f32.s32 %v493_v11  ;;  %v509_v39 = vcvt.f32.s32 %v508_v38  ;;  %vm567_vm2 = vcmp.eq.s32.totalorder %v993_v33, %v467_v55  ;;  %vm568_vm4 = vcmp.eq.s32.totalorder %v993_v33, %v482_v60 }
 0x1e4   : > { %vm783_vm3 = vmpackc.low %vm567_vm2, %vm566_vm1 }
 0x1e5   : > { %v497_v17 = vadd.s32 %v496_v59, %v494_v15  ;;  %814 = vmatpush3.bf16.msk.msra.mxu0 %vm783_vm3, %v878_v4  ;;  %v512_v56 = vadd.s32 %v511_v46, %v509_v39 }
 0x1e6   : > { %v523_v48 = vpop.xlane.xlu1 %522  ;;  %v538_v57 = vpop.xlane.xlu0 %537  ;;  %815 = vmatprep.subr.bf16.mxu0 %v876_v53 }
 0x1e7   : > { %v524_v31 = vcvt.f32.s32 %v523_v48  ;;  %v539_v20 = vcvt.f32.s32 %v538_v57  ;;  %vm569_vm5 = vcmp.eq.s32.totalorder %v993_v33, %v497_v17  ;;  %vm570_vm7 = vcmp.eq.s32.totalorder %v993_v33, %v512_v56 }
 0x1e8   : > { %vm785_vm6 = vmpackc.low %vm569_vm5, %vm568_vm4 }
 0x1e9   : > { %v527_v6 = vadd.s32 %v526_v62, %v524_v31  ;;  %816 = vmatpush3.bf16.msk.msra.mxu0 %vm785_vm6, %v878_v4  ;;  %v542_v32 = vadd.s32 %v541_v0, %v539_v20 }
 0x1ea   : > { %v553_v58 = vpop.xlane.xlu1 %552  ;;  %817 = vmatprep.subr.bf16.mxu0 %v876_v53 }
 0x1eb   : > { %v554_v3 = vcvt.f32.s32 %v553_v58  ;;  %vm571_vm8 = vcmp.eq.s32.totalorder %v993_v33, %v527_v6  ;;  %vm572_vm12 = vcmp.eq.s32.totalorder %v993_v33, %v542_v32 }
 0x1ec   : > { %vm787_vm9 = vmpackc.low %vm571_vm8, %vm570_vm7 }
 0x1ed   : > { %v557_v9 = vadd.s32 %v556_v63, %v554_v3  ;;  %818 = vmatpush3.bf16.msk.msra.mxu0 %vm787_vm9, %v878_v4 }
 0x1ee   : > { %819 = vmatprep.subr.bf16.mxu0 %v876_v53 }
 0x1ef   : > { %vm573_vm13 = vcmp.eq.s32.totalorder %v993_v33, %v557_v9 }
 0x1f0   : > { %vm789_vm14 = vmpackc.low %vm573_vm13, %vm572_vm12 }
 0x1f1   : > { %820 = vmatpush3.bf16.msk.msra.mxu0 %vm789_vm14, %v878_v4 }
 0x1f4   : > { %822 = vmatmul.mubr.msk.bf16.vlgmr.msra.gmra.mrb[0].mxu0 %vm791_vm15, %v878_v4 }
 0x2c7   : > { %v664_v47 = vpop.f32.mrb[0].mxu0 }
 0x2c8   : > { %v671_v37 = vadd.f32 %v664_v47, %v628_v2  ;;  %v823_v16 = vpop.f32.mrb[1].mxu0 }
 0x2c9   : > { %v667_v22 = vpop.f32.mrb[2].mxu0 }
 0x2ca   : > { %673 = vst.msk [vmem:[%s1226_s22] sm:$0xff] %vm215_vm0, %v671_v37  ;;  %v672_v53 = vadd.f32 %v667_v22, %v629_v36  ;;  %v824_v13 = vpop.f32.mrb[3].mxu0 }
 0x2cc   : > { %674 = vst.msk [vmem:[%s1226_s22 + $0x8] sm:$0xff] %vm215_vm0, %v672_v53 }
 0x2cd PF: > { %s12_s11 = sadd.s32 1, %s874_s11   ;;  %s1305_s9 = smov %s870_s10 }
 0x2ce   : > { %p9_p7 = scmp.ge.s32.totalorder %s12_s11, 4   ;;  %s1306_s10 = smov %s1308_s12 }
 0x2d0   :  { %11 = sbr.rel (!%p9_p7) target bundleno = 2 (0x2), region = 65 }

</bundles_post_ra>
